<compile_context>
chip_gen: v6e
topology: v6e:2x2x1
jax: 0.10.0
libtpu: 0.0.40
codegen_flags: <defaults>
</compile_context>

<pallas_src>
import functools

import jax
import jax.numpy as jnp
from jax import lax
from jax.experimental import pallas as pl
from jax.experimental.pallas import tpu as pltpu


def _basic_block_kernel(x_ref, B1_ref, b1_ref, B2_ref, b2_ref, o_ref, *, H, d):
    """One fat grid step: a slab of whole images, rows flattened to (Nb*H, W*C).

    x_ref  : (Mb, WC)      lane-dense activation slab (Mb = Nb*H, whole images)
    B*_ref : (3*WC, WC)    banded conv+BN weights, kh-major rows
    b*_ref : (1, WC)       folded BN bias tiled over the (w, c) lanes
    o_ref  : (Mb, WC)      output slab
    """
    Mb, WC = x_ref.shape
    x = x_ref[...].astype(jnp.float32)

    # Per-image row index: each block covers whole images (Mb % H == 0) and
    # starts on an image boundary, so h = row % H.
    row = lax.broadcasted_iota(jnp.int32, (Mb, 1), 0)
    h = row % H
    keep_up = h >= d          # rows where the kh=0 tap (input row h-d) exists
    keep_dn = h < (H - d)     # rows where the kh=2 tap (input row h+d) exists

    sh_up = d % Mb            # static, non-negative rotate amounts
    sh_dn = (-d) % Mb

    def conv_bn(src, B_ref, b_ref):
        # Row-shifted operands built in-register: sublane roll (XLU slot) +
        # select zeroing the d boundary rows (zero padding == dropped taps).
        # Rolls wrap across image boundaries, but exactly those rows are the
        # padding rows and get masked to zero.
        s0 = jnp.where(keep_up, pltpu.roll(src, shift=sh_up, axis=0), 0.0)
        s2 = jnp.where(keep_dn, pltpu.roll(src, shift=sh_dn, axis=0), 0.0)
        # Fuse the 3 kh taps into one K = 3*WC matmul.  Each operand is a
        # multiple of 128 lanes wide, so the concat is lane-aligned (no VMEM
        # bounce) and the matmul output is already lane-dense.
        lhs = jnp.concatenate([s0, src, s2], axis=-1)          # (Mb, 3*WC)
        return jnp.dot(lhs, B_ref[...],
                       preferred_element_type=jnp.float32) + b_ref[...]

    hact = jnp.maximum(conv_bn(x, B1_ref, b1_ref), 0.0)        # conv1+bn1+relu
    out = conv_bn(hact, B2_ref, b2_ref) + x                    # conv2+bn2 + res
    o_ref[...] = out.astype(o_ref.dtype)


def _fold_bn(gamma, beta, mean, var, eps=1e-5):
    scale = gamma / jnp.sqrt(var + eps)
    bias = beta - mean * scale
    return scale, bias


def _band_weights(w_hwio, scale, W, d):
    """Fold the BN scale into the conv weights and expand the horizontal (kw)
    taps + channel contraction into block-banded matrices, stacking the 3 kh
    bands row-wise so the kernel does ONE matmul with K = 3*W*Cin.

    w_hwio: (3, 3, Cin, Cout).  Returns (3*W*Cin, W*Cout) with
    B[kh*W*Cin + w_in*Cin + ci, w_out*Cout + co] = w[kh, kw, ci, co]
    where kw = (w_in - w_out + d) / d if it lands in {0, 1, 2}, else 0
    (zero padding in W == dropping out-of-range taps).
    """
    w = (w_hwio * scale[None, None, None, :]).astype(jnp.float32)
    Cin, Cout = w.shape[2], w.shape[3]
    kw = jnp.arange(3)
    pos = jnp.arange(W)
    # mask[kw, w_in, w_out] = input col w_in feeds output col w_out via tap kw
    mask = (pos[None, :, None] == pos[None, None, :] + (kw[:, None, None] - 1) * d)
    B = jnp.einsum("kab,hkio->haibo", mask.astype(jnp.float32), w)
    return B.reshape(3 * W * Cin, W * Cout)


def _grid_steps(N):
    """2 fat 'parallel' steps on a 2-TensorCore chip (v7x); otherwise collapse
    the whole batch into one fat step (grid is a serial loop on single-TC
    v5e/v6e and every step pays ~0.35 us of fixed overhead)."""
    kind = ""
    try:
        kind = jax.devices()[0].device_kind.lower()
    except Exception:
        pass
    if ("v7" in kind or "7x" in kind) and N % 2 == 0 and N >= 2:
        return 2
    return 1


def basic_block_lane_dense(x_ld, params, *, N, H, W, pad=1, dilation=1):
    """BasicBlock.forward on a lane-dense (N*H, W*C) activation slab.

    Keeping activations in this layout across blocks lets an end-to-end network
    hoist the NCHW<->lane-dense relayout to the network boundary instead of
    paying two full-activation transposes per block.
    """
    d = dilation
    eff_pad = dilation if dilation > 1 else pad
    assert eff_pad == dilation, (
        "only output-size-preserving convs supported (pad must equal dilation); "
        "required anyway for the residual add with downsample=None")
    Cin = params["w1"].shape[2]
    Cout = params["w1"].shape[-1]
    assert Cout == Cin and params["w2"].shape[-1] == Cout, (
        "residual add with downsample=None requires in_num == out_num")
    WC = W * Cout
    assert x_ld.shape == (N * H, WC), (x_ld.shape, (N * H, WC))
    assert WC % 128 == 0, (
        f"W*C = {WC} must be a multiple of 128 for the fully lane-dense layout "
        "(otherwise masked-lane layouts / lowering surprises)")

    G = _grid_steps(N)
    Mb = (N // G) * H
    assert N % G == 0 and (G == 1 or Mb % 8 == 0), (
        "each grid block must cover whole images and be sublane-aligned")

    s1, b1 = _fold_bn(params["gamma1"], params["beta1"],
                      params["mean1"], params["var1"])
    s2, b2 = _fold_bn(params["gamma2"], params["beta2"],
                      params["mean2"], params["var2"])
    B1 = _band_weights(params["w1"], s1, W, d)                 # (3*WC, WC)
    B2 = _band_weights(params["w2"], s2, W, d)
    b1t = jnp.tile(b1.astype(jnp.float32), W).reshape(1, WC)   # lane-dense bias
    b2t = jnp.tile(b2.astype(jnp.float32), W).reshape(1, WC)

    kernel = functools.partial(_basic_block_kernel, H=H, d=d)

    return pl.pallas_call(
        kernel,
        out_shape=jax.ShapeDtypeStruct((N * H, WC), x_ld.dtype),
        grid=(G,),
        in_specs=[
            pl.BlockSpec((Mb, WC), lambda g: (g, 0)),          # activations
            pl.BlockSpec((3 * WC, WC), lambda g: (0, 0)),      # banded conv1+bn1
            pl.BlockSpec((1, WC), lambda g: (0, 0)),           # bias1
            pl.BlockSpec((3 * WC, WC), lambda g: (0, 0)),      # banded conv2+bn2
            pl.BlockSpec((1, WC), lambda g: (0, 0)),           # bias2
        ],
        out_specs=pl.BlockSpec((Mb, WC), lambda g: (g, 0)),
        compiler_params=pltpu.CompilerParams(
            dimension_semantics=("parallel",),
            vmem_limit_bytes=32 * 1024 * 1024),
    )(x_ld, B1, b1t, B2, b2t)


def basic_block_forward(x_nchw, params, *, pad=1, dilation=1):
    """BasicBlock.forward (stride=1, downsample=None, eval-mode BN), NCHW io."""
    N, Cin, H, W = x_nchw.shape
    # NCHW -> lane-dense (N*H, W*C); minor dim is a multiple of 128 so every
    # kernel load/store/matmul-output is an unmasked full-lane op.
    x_ld = jnp.transpose(x_nchw, (0, 2, 3, 1)).reshape(N * H, W * Cin)
    out_ld = basic_block_lane_dense(x_ld, params, N=N, H=H, W=W,
                                    pad=pad, dilation=dilation)
    return jnp.transpose(out_ld.reshape(N, H, W, Cin), (0, 3, 1, 2))


def _reference_forward(x_nchw, params, *, pad=1, dilation=1):
    """Pure-JAX reference using lax.conv_general_dilated (NCHW/OIHW)."""
    eff_pad = dilation if dilation > 1 else pad

    def convbn(x, w_hwio, gamma, beta, mean, var):
        w_oihw = jnp.transpose(w_hwio, (3, 2, 0, 1))
        y = lax.conv_general_dilated(
            x, w_oihw, window_strides=(1, 1),
            padding=((eff_pad, eff_pad), (eff_pad, eff_pad)),
            rhs_dilation=(dilation, dilation),
            dimension_numbers=("NCHW", "OIHW", "NCHW"))
        s = gamma / jnp.sqrt(var + 1e-5)
        b = beta - mean * s
        return y * s[None, :, None, None] + b[None, :, None, None]

    h = jnp.maximum(convbn(x_nchw, params["w1"], params["gamma1"],
                           params["beta1"], params["mean1"], params["var1"]), 0.0)
    out = convbn(h, params["w2"], params["gamma2"],
                 params["beta2"], params["mean2"], params["var2"])
    return out + x_nchw   # NB: no final ReLU in this BasicBlock variant


def init_params(key, in_num, out_num):
    ks = jax.random.split(key, 10)
    return {
        "w1": jax.random.normal(ks[0], (3, 3, in_num, out_num), jnp.float32) * 0.1,
        "gamma1": 1.0 + 0.1 * jax.random.normal(ks[1], (out_num,), jnp.float32),
        "beta1": 0.1 * jax.random.normal(ks[2], (out_num,), jnp.float32),
        "mean1": 0.05 * jax.random.normal(ks[3], (out_num,), jnp.float32),
        "var1": 0.5 + jnp.abs(jax.random.normal(ks[4], (out_num,), jnp.float32)),
        "w2": jax.random.normal(ks[5], (3, 3, out_num, out_num), jnp.float32) * 0.1,
        "gamma2": 1.0 + 0.1 * jax.random.normal(ks[6], (out_num,), jnp.float32),
        "beta2": 0.1 * jax.random.normal(ks[7], (out_num,), jnp.float32),
        "mean2": 0.05 * jax.random.normal(ks[8], (out_num,), jnp.float32),
        "var2": 0.5 + jnp.abs(jax.random.normal(ks[9], (out_num,), jnp.float32)),
    }


if __name__ == "__main__":
    key = jax.random.PRNGKey(0)
    kx, kp = jax.random.split(key)

    # BasicBlock(in_num=8, out_num=8, stride=1, downsample=None, pad=1, dilation=1)
    N, C, H, W = 2, 8, 16, 16          # W*C = 128 -> fully lane-dense minor dim
    x = jax.random.normal(kx, (N, C, H, W), jnp.float32)
    params = init_params(kp, C, C)

    out = jax.block_until_ready(basic_block_forward(x, params, pad=1, dilation=1))
    ref = _reference_forward(x, params, pad=1, dilation=1)

    assert out.shape == (N, C, H, W)
    max_err = float(jnp.max(jnp.abs(out - ref)))
    assert jnp.allclose(out, ref, atol=1e-3, rtol=1e-3), max_err

    print("KERNEL_OK")
</pallas_src>

<mosaic_0001>
module attributes {stable_mosaic.version = 11 : i64} {
  func.func @_basic_block_kernel(%arg0: i32, %arg1: memref<32x128xf32, #tpu.memory_space<vmem>>, %arg2: memref<384x128xf32, #tpu.memory_space<vmem>>, %arg3: memref<1x128xf32, #tpu.memory_space<vmem>>, %arg4: memref<384x128xf32, #tpu.memory_space<vmem>>, %arg5: memref<1x128xf32, #tpu.memory_space<vmem>>, %arg6: memref<32x128xf32, #tpu.memory_space<vmem>>) attributes {dimension_semantics = [#tpu.dimension_semantics<parallel>], iteration_bounds = array<i64: 1>, scalar_prefetch = 0 : i64, scratch_operands = 0 : i64, tpu.core_type = #tpu.core_type<tc>, window_params = [{transform_indices = @transform_0, window_bounds = array<i64: 32, 128>}, {pipeline_mode = #tpu.pipeline_mode<synchronous>, transform_indices = @transform_1, window_bounds = array<i64: 384, 128>}, {pipeline_mode = #tpu.pipeline_mode<synchronous>, transform_indices = @transform_2, window_bounds = array<i64: 1, 128>}, {pipeline_mode = #tpu.pipeline_mode<synchronous>, transform_indices = @transform_3, window_bounds = array<i64: 384, 128>}, {pipeline_mode = #tpu.pipeline_mode<synchronous>, transform_indices = @transform_4, window_bounds = array<i64: 1, 128>}, {transform_indices = @transform_5, window_bounds = array<i64: 32, 128>}]} {
    %c0 = arith.constant 0 : index
    %c0_0 = arith.constant 0 : index
    %0 = vector.load %arg1[%c0, %c0_0] : memref<32x128xf32, #tpu.memory_space<vmem>>, vector<32x128xf32>
    %1 = tpu.iota {dimensions = array<i32: 0>} : vector<32x1xi32>
    %c16_i32 = arith.constant 16 : i32
    %c0_i32 = arith.constant 0 : i32
    %2 = arith.cmpi eq, %c16_i32, %c0_i32 : i32
    %c1_i32 = arith.constant 1 : i32
    %3 = arith.select %2, %c1_i32, %c16_i32 : i32
    %4 = vector.broadcast %3 : i32 to vector<32x1xi32>
    %5 = arith.remsi %1, %4 : vector<32x1xi32>
    %c0_i32_1 = arith.constant 0 : i32
    %6 = vector.broadcast %c0_i32_1 : i32 to vector<32x1xi32>
    %7 = arith.cmpi ne, %5, %6 : vector<32x1xi32>
    %c0_i32_2 = arith.constant 0 : i32
    %8 = vector.broadcast %c0_i32_2 : i32 to vector<32x1xi32>
    %9 = arith.cmpi slt, %5, %8 : vector<32x1xi32>
    %c0_i32_3 = arith.constant 0 : i32
    %10 = arith.cmpi slt, %3, %c0_i32_3 : i32
    %11 = vector.broadcast %10 : i1 to vector<32x1xi1>
    %12 = vector.broadcast %11 : vector<32x1xi1> to vector<32x1xi1>
    %13 = arith.xori %9, %12 : vector<32x1xi1>
    %14 = arith.andi %13, %7 : vector<32x1xi1>
    %15 = vector.broadcast %3 : i32 to vector<32x1xi32>
    %16 = arith.addi %5, %15 : vector<32x1xi32>
    %17 = arith.select %14, %16, %5 : vector<32x1xi1>, vector<32x1xi32>
    %c1_i32_4 = arith.constant 1 : i32
    %18 = vector.broadcast %c1_i32_4 : i32 to vector<32x1xi32>
    %19 = arith.cmpi sge, %17, %18 : vector<32x1xi32>
    %c15_i32 = arith.constant 15 : i32
    %20 = vector.broadcast %c15_i32 : i32 to vector<32x1xi32>
    %21 = arith.cmpi slt, %17, %20 : vector<32x1xi32>
    %c1_i32_5 = arith.constant 1 : i32
    %22 = tpu.dynamic_rotate %0 by %c1_i32_5 dim 0 : vector<32x128xf32>, i32 -> vector<32x128xf32>
    %cst = arith.constant 0.000000e+00 : f32
    %23 = vector.shape_cast %19 : vector<32x1xi1> to vector<32x1xi1>
    %24 = vector.broadcast %23 : vector<32x1xi1> to vector<32x128xi1>
    %25 = vector.broadcast %cst : f32 to vector<32x128xf32>
    %26 = arith.select %24, %22, %25 : vector<32x128xi1>, vector<32x128xf32>
    %c31_i32 = arith.constant 31 : i32
    %27 = tpu.dynamic_rotate %0 by %c31_i32 dim 0 : vector<32x128xf32>, i32 -> vector<32x128xf32>
    %cst_6 = arith.constant 0.000000e+00 : f32
    %28 = vector.shape_cast %21 : vector<32x1xi1> to vector<32x1xi1>
    %29 = vector.broadcast %28 : vector<32x1xi1> to vector<32x128xi1>
    %30 = vector.broadcast %cst_6 : f32 to vector<32x128xf32>
    %31 = arith.select %29, %27, %30 : vector<32x128xi1>, vector<32x128xf32>
    %32 = tpu.concatenate %26, %0, %31 in 1 : vector<32x128xf32>, vector<32x128xf32>, vector<32x128xf32> -> vector<32x384xf32>
    %c0_7 = arith.constant 0 : index
    %c0_8 = arith.constant 0 : index
    %33 = vector.load %arg2[%c0_7, %c0_8] : memref<384x128xf32, #tpu.memory_space<vmem>>, vector<384x128xf32>
    %cst_9 = arith.constant dense<0.000000e+00> : vector<32x128xf32>
    %34 = tpu.matmul %32, %33, %cst_9 {dimension_numbers = #tpu.dot_dimension_numbers<[1], [0], [0], [1], [0, 0, 1, 1], [], []>} : vector<32x384xf32>, vector<384x128xf32>, vector<32x128xf32> -> vector<32x128xf32>
    %c0_10 = arith.constant 0 : index
    %c0_11 = arith.constant 0 : index
    %35 = vector.load %arg3[%c0_10, %c0_11] : memref<1x128xf32, #tpu.memory_space<vmem>>, vector<1x128xf32>
    %36 = vector.broadcast %35 : vector<1x128xf32> to vector<32x128xf32>
    %37 = arith.addf %34, %36 : vector<32x128xf32>
    %cst_12 = arith.constant 0.000000e+00 : f32
    %38 = vector.broadcast %cst_12 : f32 to vector<32x128xf32>
    %39 = arith.maximumf %37, %38 : vector<32x128xf32>
    %c1_i32_13 = arith.constant 1 : i32
    %40 = tpu.dynamic_rotate %39 by %c1_i32_13 dim 0 : vector<32x128xf32>, i32 -> vector<32x128xf32>
    %cst_14 = arith.constant 0.000000e+00 : f32
    %41 = vector.shape_cast %19 : vector<32x1xi1> to vector<32x1xi1>
    %42 = vector.broadcast %41 : vector<32x1xi1> to vector<32x128xi1>
    %43 = vector.broadcast %cst_14 : f32 to vector<32x128xf32>
    %44 = arith.select %42, %40, %43 : vector<32x128xi1>, vector<32x128xf32>
    %c31_i32_15 = arith.constant 31 : i32
    %45 = tpu.dynamic_rotate %39 by %c31_i32_15 dim 0 : vector<32x128xf32>, i32 -> vector<32x128xf32>
    %cst_16 = arith.constant 0.000000e+00 : f32
    %46 = vector.shape_cast %21 : vector<32x1xi1> to vector<32x1xi1>
    %47 = vector.broadcast %46 : vector<32x1xi1> to vector<32x128xi1>
    %48 = vector.broadcast %cst_16 : f32 to vector<32x128xf32>
    %49 = arith.select %47, %45, %48 : vector<32x128xi1>, vector<32x128xf32>
    %50 = tpu.concatenate %44, %39, %49 in 1 : vector<32x128xf32>, vector<32x128xf32>, vector<32x128xf32> -> vector<32x384xf32>
    %c0_17 = arith.constant 0 : index
    %c0_18 = arith.constant 0 : index
    %51 = vector.load %arg4[%c0_17, %c0_18] : memref<384x128xf32, #tpu.memory_space<vmem>>, vector<384x128xf32>
    %cst_19 = arith.constant dense<0.000000e+00> : vector<32x128xf32>
    %52 = tpu.matmul %50, %51, %cst_19 {dimension_numbers = #tpu.dot_dimension_numbers<[1], [0], [0], [1], [0, 0, 1, 1], [], []>} : vector<32x384xf32>, vector<384x128xf32>, vector<32x128xf32> -> vector<32x128xf32>
    %c0_20 = arith.constant 0 : index
    %c0_21 = arith.constant 0 : index
    %53 = vector.load %arg5[%c0_20, %c0_21] : memref<1x128xf32, #tpu.memory_space<vmem>>, vector<1x128xf32>
    %54 = vector.broadcast %53 : vector<1x128xf32> to vector<32x128xf32>
    %55 = arith.addf %52, %54 : vector<32x128xf32>
    %56 = arith.addf %55, %0 : vector<32x128xf32>
    %c0_22 = arith.constant 0 : index
    %c0_23 = arith.constant 0 : index
    %57 = vector.load %arg6[%c0_22, %c0_23] : memref<32x128xf32, #tpu.memory_space<vmem>>, vector<32x128xf32>
    tpu.vector_store %arg6[%c0_22, %c0_23], %56 {strides = array<i32>} : memref<32x128xf32, #tpu.memory_space<vmem>>, vector<32x128xf32>,
    return
  }
  func.func @transform_0(%arg0: i32) -> (i32, i32) {
    %c0_i32 = arith.constant 0 : i32
    %c0_i32_0 = arith.constant 0 : i32
    return %arg0, %c0_i32 : i32, i32
  }
  func.func @transform_1(%arg0: i32) -> (i32, i32) {
    %c0_i32 = arith.constant 0 : i32
    %c0_i32_0 = arith.constant 0 : i32
    %c0_i32_1 = arith.constant 0 : i32
    return %c0_i32, %c0_i32_0 : i32, i32
  }
  func.func @transform_2(%arg0: i32) -> (i32, i32) {
    %c0_i32 = arith.constant 0 : i32
    %c0_i32_0 = arith.constant 0 : i32
    %c0_i32_1 = arith.constant 0 : i32
    return %c0_i32, %c0_i32_0 : i32, i32
  }
  func.func @transform_3(%arg0: i32) -> (i32, i32) {
    %c0_i32 = arith.constant 0 : i32
    %c0_i32_0 = arith.constant 0 : i32
    %c0_i32_1 = arith.constant 0 : i32
    return %c0_i32, %c0_i32_0 : i32, i32
  }
  func.func @transform_4(%arg0: i32) -> (i32, i32) {
    %c0_i32 = arith.constant 0 : i32
    %c0_i32_0 = arith.constant 0 : i32
    %c0_i32_1 = arith.constant 0 : i32
    return %c0_i32, %c0_i32_0 : i32, i32
  }
  func.func @transform_5(%arg0: i32) -> (i32, i32) {
    %c0_i32 = arith.constant 0 : i32
    %c0_i32_0 = arith.constant 0 : i32
    return %arg0, %c0_i32 : i32, i32
  }
}

</mosaic_0001>

<bundles_post_ra>
// kernel: tpu_custom_call.1
= control target key start
LH: loop header
LB: loop body
LE: loop exit
PB: predicated region body
PF: predicated region fallthrough
CT: control target
= control target key end

     0   :  { %10 = vsyncpa [#allocation3], 0  ;;  %s1145_s0 = inlined_call_operand.hbm [shape: f32[32,128], index: 0, kind: input, shape index: {}]   ;;  %s1146_s1 = inlined_call_operand.hbm [shape: f32[384,128], index: 1, kind: input, shape index: {}]   ;;  %s1147_s2 = inlined_call_operand.vmem [shape: f32[1,128], index: 2, kind: input, shape index: {}]   ;;  %s1148_s3 = inlined_call_operand.hbm [shape: f32[384,128], index: 3, kind: input, shape index: {}]   ;;  %s1149_s4 = inlined_call_operand.vmem [shape: f32[1,128], index: 4, kind: input, shape index: {}]   ;;  %s1150_s5 = inlined_call_operand.hbm [shape: f32[32,128], index: 5, kind: output, shape index: {}]  }
   0x1   :  { %11 = vsyncpa [#allocation6], 0 }
   0x2   :  { %12 = vsyncpa [#allocation4], 0  ;;  %s979_s18 = smov [#allocation5]   ;;  %s980_s20 = smov [#allocation2]  }
   0x3   :  { %s30_s19 = sshll.u32 %s979_s18, 4  ;;  %s18_s21 = sshll.u32 %s980_s20, 4  ;;  %s31_s19 = int_to_ptr.vmem [resolvable:$true] %s30_s19  ;;  %s19_s21 = int_to_ptr.vmem [resolvable:$true] %s18_s21 }
   0x4   :  { %s901_s22 = scalar_lea.vmem %s31_s19, 6144  ;;  %p906_p1 = scmp.lt.s32.totalorder %s31_s19, %s31_s19 }
   0x5   :  { %p902_p0 = scmp.ne.s32.totalorder %s31_s19, %s901_s22  ;;  %p907_p2 = scmp.lt.s32.totalorder %s901_s22, %s901_s22 }
   0x7   :  { %p908_p3 = por %p907_p2, %p906_p1 }
   0x9   :  { %p909_p4 = pnand %p908_p3, %p902_p0 }
   0xb   :  { %912 = shalt.err (!%p909_p4)
}
   0xc   :  { %s981_s23 = smov 128   ;;  %s982_s24 = smov 8  }
   0xd   :  { %36 = dma.hbm_to_vmem [thread:$0]  %s1146_s1, 6144, %s31_s19, [#allocation6], %s981_s23, %s981_s23, %s982_s24  }
   0xe   :  { %s921_s27 = scalar_lea.vmem %s19_s21, 512  ;;  %p926_p6 = scmp.lt.s32.totalorder %s19_s21, %s19_s21 }
   0xf   :  { %p922_p5 = scmp.ne.s32.totalorder %s19_s21, %s921_s27  ;;  %p927_p7 = scmp.lt.s32.totalorder %s921_s27, %s921_s27 }
  0x11   :  { %p928_p8 = por %p927_p7, %p926_p6 }
  0x13   :  { %p929_p9 = pnand %p928_p8, %p922_p5 }
  0x15   :  { %932 = shalt.err (!%p929_p9)
}
  0x16   :  { %24 = dma.hbm_to_vmem [thread:$0]  %s1145_s0, 512, %s19_s21, [#allocation3], %s981_s23, %s981_s23, %s982_s24  }
  0x17   :  { %s983_s30 = smov [#allocation7]  }
  0x18   :  { %s44_s6 = sshll.u32 %s983_s30, 4  ;;  %s45_s6 = int_to_ptr.vmem [resolvable:$true] %s44_s6 }
  0x19   :  { %s941_s7 = scalar_lea.vmem %s45_s6, 6144  ;;  %p946_p11 = scmp.lt.s32.totalorder %s45_s6, %s45_s6 }
  0x1a   :  { %p942_p10 = scmp.ne.s32.totalorder %s45_s6, %s941_s7  ;;  %p947_p12 = scmp.lt.s32.totalorder %s941_s7, %s941_s7 }
  0x1c   :  { %p948_p13 = por %p947_p12, %p946_p11 }
  0x1e   :  { %p949_p0 = pnand %p948_p13, %p942_p10 }
  0x20   :  { %952 = shalt.err (!%p949_p0)
}
  0x21   :  { %50 = dma.hbm_to_vmem [thread:$0]  %s1148_s3, 6144, %s45_s6, [#allocation6], %s981_s23, %s981_s23, %s982_s24  }
  0x22   :  { %973 = dma.done.wait [#allocation3], 512  }
  0x23   :  { %974 = vsyncadd [#allocation3], 4294966784 }
  0x24   :  { %975 = dma.done.wait [#allocation6], 12288  }
  0x25   :  { %976 = vsyncadd [#allocation6], 4294955008  ;;  %v200_v0 = vld [vmem:[#allocation5 + $0xf8] sm:$0xff]  ;;  %v199_v2 = vld [vmem:[#allocation5 + $0xf0] sm:$0xff]  ;;  %v66_v31 = vlaneseq }
  0x26   :  { %v184_v1 = vld [vmem:[#allocation5 + $0x78] sm:$0xff]  ;;  %683 = vmatprep.subr.mxu0 %v200_v0  ;;  %v183_v3 = vld [vmem:[#allocation5 + $0x70] sm:$0xff]  ;;  %v198_v5 = vld [vmem:[#allocation5 + $0xe8] sm:$0xff] }
  0x27   :  { %v216_v4 = vld [vmem:[#allocation5 + $0x178] sm:$0xff]  ;;  %684 = vmatpush3.msra.mxu0 %v184_v1  ;;  %v215_v6 = vld [vmem:[#allocation5 + $0x170] sm:$0xff]  ;;  %v182_v7 = vld [vmem:[#allocation5 + $0x68] sm:$0xff]  ;;  %v1033_v39 = vshrl.u32 %v66_v31, 7 }
  0x28   :  { %811 = vmatprep.subr.mxu1 %v216_v4  ;;  %685 = vmatprep.subr.mxu0 %v199_v2  ;;  %v214_v8 = vld [vmem:[#allocation5 + $0x168] sm:$0xff]  ;;  %v197_v9 = vld [vmem:[#allocation5 + $0xe0] sm:$0xff]  ;;  %v196_v12 = vld [vmem:[#allocation5 + $0xd8] sm:$0xff] }
  0x29   :  { %812 = vmatpush3.msra.mxu1 %v216_v4  ;;  %686 = vmatpush3.msra.mxu0 %v183_v3  ;;  %v181_v10 = vld [vmem:[#allocation5 + $0x60] sm:$0xff]  ;;  %v180_v13 = vld [vmem:[#allocation5 + $0x58] sm:$0xff]  ;;  %v195_v15 = vld [vmem:[#allocation5 + $0xd0] sm:$0xff]  ;;  %v68_v47 = vadd.s32 8, %v1033_v39  ;;  %v75_v50 = vand.u32 15, %v1033_v39  ;;  %vm131_vm0 = vcmp.lt.s32.totalorder %v1033_v39, 1 }
  0x2a   :  { %813 = vmatprep.subr.mxu1 %v215_v6  ;;  %687 = vmatprep.subr.mxu0 %v198_v5  ;;  %v213_v11 = vld [vmem:[#allocation5 + $0x160] sm:$0xff]  ;;  %v212_v14 = vld [vmem:[#allocation5 + $0x158] sm:$0xff]  ;;  %v179_v16 = vld [vmem:[#allocation5 + $0x50] sm:$0xff]  ;;  %vm152_vm1 = vcmp.lt.s32.totalorder %v1033_v39, 7  ;;  %v69_v61 = vadd.s32 16, %v1033_v39  ;;  %v70_v62 = vadd.s32 24, %v1033_v39 }
  0x2b   :  { %814 = vmatpush3.msra.mxu1 %v215_v6  ;;  %688 = vmatpush3.msra.mxu0 %v182_v7  ;;  %v211_v17 = vld [vmem:[#allocation5 + $0x150] sm:$0xff]  ;;  %v194_v18 = vld [vmem:[#allocation5 + $0xc8] sm:$0xff]  ;;  %v193_v21 = vld [vmem:[#allocation5 + $0xc0] sm:$0xff]  ;;  %v82_v59 = vand.u32 15, %v68_v47  ;;  %vm1055_vm2 = vcmp.ge.s32.totalorder %v75_v50, 1 }
  0x2c   :  { %815 = vmatprep.subr.mxu1 %v214_v8  ;;  %689 = vmatprep.subr.mxu0 %v197_v9  ;;  %v178_v19 = vld [vmem:[#allocation5 + $0x48] sm:$0xff]  ;;  %v177_v22 = vld [vmem:[#allocation5 + $0x40] sm:$0xff]  ;;  %v192_v24 = vld [vmem:[#allocation5 + $0xb8] sm:$0xff] }
  0x2d   :  { %816 = vmatpush3.msra.mxu1 %v214_v8  ;;  %690 = vmatpush3.msra.mxu0 %v181_v10  ;;  %v210_v20 = vld [vmem:[#allocation5 + $0x148] sm:$0xff]  ;;  %v209_v23 = vld [vmem:[#allocation5 + $0x140] sm:$0xff]  ;;  %v176_v25 = vld [vmem:[#allocation5 + $0x38] sm:$0xff]  ;;  %vm1069_vm3 = vcmp.lt.s32.totalorder %v82_v59, 15  ;;  %v96_v8 = vand.u32 15, %v70_v62 }
  0x2e   :  { %817 = vmatprep.subr.mxu1 %v213_v11  ;;  %691 = vmatprep.subr.mxu0 %v196_v12  ;;  %v208_v26 = vld [vmem:[#allocation5 + $0x138] sm:$0xff]  ;;  %v191_v27 = vld [vmem:[#allocation5 + $0xb0] sm:$0xff]  ;;  %v190_v30 = vld [vmem:[#allocation5 + $0xa8] sm:$0xff] }
  0x2f   :  { %818 = vmatpush3.msra.mxu1 %v213_v11  ;;  %692 = vmatpush3.msra.mxu0 %v180_v13  ;;  %v175_v28 = vld [vmem:[#allocation5 + $0x30] sm:$0xff]  ;;  %v174_v32 = vld [vmem:[#allocation5 + $0x28] sm:$0xff]  ;;  %v189_v34 = vld [vmem:[#allocation5 + $0xa0] sm:$0xff]  ;;  %v89_v11 = vand.u32 15, %v69_v61  ;;  %vm1083_vm4 = vcmp.lt.s32.totalorder %v96_v8, 15 }
  0x30   :  { %819 = vmatprep.subr.mxu1 %v212_v14  ;;  %693 = vmatprep.subr.mxu0 %v195_v15  ;;  %v207_v29 = vld [vmem:[#allocation5 + $0x130] sm:$0xff]  ;;  %v206_v33 = vld [vmem:[#allocation5 + $0x128] sm:$0xff]  ;;  %v173_v35 = vld [vmem:[#allocation5 + $0x20] sm:$0xff] }
  0x31   :  { %820 = vmatpush3.msra.mxu1 %v212_v14  ;;  %694 = vmatpush3.msra.mxu0 %v179_v16  ;;  %v205_v36 = vld [vmem:[#allocation5 + $0x120] sm:$0xff]  ;;  %v188_v37 = vld [vmem:[#allocation5 + $0x98] sm:$0xff]  ;;  %v187_v43 = vld [vmem:[#allocation5 + $0x90] sm:$0xff]  ;;  %vm1090_vm5 = vcmp.ge.s32.totalorder %v89_v11, 1 }
  0x32   :  { %821 = vmatprep.subr.mxu1 %v211_v17  ;;  %695 = vmatprep.subr.mxu0 %v194_v18  ;;  %v172_v38 = vld [vmem:[#allocation5 + $0x18] sm:$0xff]  ;;  %v1035_v41 = vld [vmem:[#allocation2] sm:$0xff]  ;;  %v171_v44 = vld [vmem:[#allocation5 + $0x10] sm:$0xff] }
  0x33   :  { %822 = vmatpush3.msra.mxu1 %v211_v17  ;;  %696 = vmatpush3.msra.mxu0 %v178_v19  ;;  %v204_v40 = vld [vmem:[#allocation5 + $0x118] sm:$0xff]  ;;  %v203_v45 = vld [vmem:[#allocation5 + $0x110] sm:$0xff]  ;;  %v1039_v46 = vld [vmem:[#allocation2 + $0x8] sm:$0xff]  ;;  %v127_v49 = vrot.slane %v1035_v41, 7  ;;  %v148_v56 = vrot.slane %v1035_v41, 1 }
  0x34   :  { %823 = vmatprep.subr.mxu1 %v210_v20  ;;  %697 = vmatprep.subr.mxu0 %v193_v21  ;;  %v1037_v42 = vld [vmem:[#allocation2 + $0x18] sm:$0xff]  ;;  %v186_v48 = vld [vmem:[#allocation5 + $0x88] sm:$0xff]  ;;  %v1045_v52 = vld [vmem:[#allocation2 + $0x10] sm:$0xff]  ;;  %v149_v57 = vrot.slane %v1039_v46, 1  ;;  %v128_v2 = vrot.slane %v1039_v46, 7 }
  0x35   :  { %824 = vmatpush3.msra.mxu1 %v210_v20  ;;  %698 = vmatpush3.msra.mxu0 %v177_v22  ;;  %v130_v51 = vrot.slane %v1037_v42, 7  ;;  %v170_v53 = vld [vmem:[#allocation5 + $0x8] sm:$0xff]  ;;  %v185_v54 = vld [vmem:[#allocation5 + $0x80] sm:$0xff]  ;;  %v150_v60 = vrot.slane %v1045_v52, 1  ;;  %v151_v3 = vrot.slane %v1037_v42, 1  ;;  %v469_v5 = vld [vmem:[#allocation7 + $0x178] sm:$0xff] }
  0x36   :  { %825 = vmatprep.subr.mxu1 %v209_v23  ;;  %699 = vmatprep.subr.mxu0 %v192_v24  ;;  %v202_v55 = vld [vmem:[#allocation5 + $0x108] sm:$0xff]  ;;  %v169_v58 = vld [vmem:[#allocation5] sm:$0xff]  ;;  %v155_v4 = vsel %vm152_vm1, %v148_v56, %v149_v57  ;;  %v453_v9 = vld [vmem:[#allocation7 + $0xf8] sm:$0xff]  ;;  %v134_v10 = vsel %vm131_vm0, %v127_v49, %v128_v2  ;;  %v129_v12 = vrot.slane %v1045_v52, 7 }
  0x37   :  { %826 = vmatpush3.msra.mxu1 %v209_v23  ;;  %700 = vmatpush3.msra.mxu0 %v176_v25  ;;  %v135_v0 = vsel %vm131_vm0, %v130_v51, %v127_v49  ;;  %v201_v1 = vld [vmem:[#allocation5 + $0x100] sm:$0xff]  ;;  %v154_v7 = vsel %vm152_vm1, %v149_v57, %v150_v60  ;;  %v153_v13 = vsel %vm152_vm1, %v150_v60, %v151_v3  ;;  %v468_v14 = vld [vmem:[#allocation7 + $0x170] sm:$0xff]  ;;  %v437_v15 = vld [vmem:[#allocation7 + $0x78] sm:$0xff] }
  0x38   :  { %827 = vmatprep.subr.mxu1 %v208_v26  ;;  %701 = vmatprep.subr.mxu0 %v191_v27  ;;  %v156_v17 = vsel %vm152_vm1, %v151_v3, %v148_v56  ;;  %v452_v18 = vld [vmem:[#allocation7 + $0xf0] sm:$0xff]  ;;  %v133_v20 = vsel %vm131_vm0, %v128_v2, %v129_v12  ;;  %v467_v21 = vld [vmem:[#allocation7 + $0x168] sm:$0xff]  ;;  %v466_v23 = vld [vmem:[#allocation7 + $0x160] sm:$0xff]  ;;  %v132_v25 = vsel %vm131_vm0, %v129_v12, %v130_v51 }
  0x39   :  { %828 = vmatpush3.msra.mxu1 %v208_v26  ;;  %702 = vmatpush3.msra.mxu0 %v175_v28  ;;  %v436_v22 = vld [vmem:[#allocation7 + $0x70] sm:$0xff]  ;;  %v451_v24 = vld [vmem:[#allocation7 + $0xe8] sm:$0xff]  ;;  %v465_v26 = vld [vmem:[#allocation7 + $0x158] sm:$0xff] }
  0x3a   :  { %829 = vmatprep.subr.mxu1 %v207_v29  ;;  %703 = vmatprep.subr.mxu0 %v190_v30  ;;  %v435_v27 = vld [vmem:[#allocation7 + $0x68] sm:$0xff]  ;;  %v450_v28 = vld [vmem:[#allocation7 + $0xe0] sm:$0xff]  ;;  %v449_v31 = vld [vmem:[#allocation7 + $0xd8] sm:$0xff] }
  0x3b   :  { %830 = vmatpush3.msra.mxu1 %v207_v29  ;;  %704 = vmatpush3.msra.mxu0 %v174_v32  ;;  %v464_v29 = vld [vmem:[#allocation7 + $0x150] sm:$0xff]  ;;  %v434_v30 = vld [vmem:[#allocation7 + $0x60] sm:$0xff]  ;;  %v463_v32 = vld [vmem:[#allocation7 + $0x148] sm:$0xff] }
  0x3c   :  { %831 = vmatprep.subr.mxu1 %v206_v33  ;;  %705 = vmatprep.subr.mxu0 %v189_v34  ;;  %v448_v34 = vld [vmem:[#allocation7 + $0xd0] sm:$0xff]  ;;  %v445_v47 = vld [vmem:[#allocation7 + $0xb8] sm:$0xff]  ;;  %v458_v51 = vld [vmem:[#allocation7 + $0x120] sm:$0xff] }
  0x3d   :  { %832 = vmatpush3.msra.mxu1 %v206_v33  ;;  %706 = vmatpush3.msra.mxu0 %v173_v35  ;;  %v433_v33 = vld [vmem:[#allocation7 + $0x58] sm:$0xff]  ;;  %v462_v35 = vld [vmem:[#allocation7 + $0x140] sm:$0xff]  ;;  %v444_v50 = vld [vmem:[#allocation7 + $0xb0] sm:$0xff] }
  0x3e   :  { %833 = vmatprep.subr.mxu1 %v205_v36  ;;  %707 = vmatprep.subr.mxu0 %v188_v37  ;;  %v447_v37 = vld [vmem:[#allocation7 + $0xc8] sm:$0xff]  ;;  %v429_v49 = vld [vmem:[#allocation7 + $0x38] sm:$0xff]  ;;  %v442_v57 = vld [vmem:[#allocation7 + $0xa0] sm:$0xff] }
  0x3f   :  { %834 = vmatpush3.msra.mxu1 %v205_v36  ;;  %708 = vmatpush3.msra.mxu0 %v172_v38  ;;  %v432_v36 = vld [vmem:[#allocation7 + $0x50] sm:$0xff]  ;;  %v461_v38 = vld [vmem:[#allocation7 + $0x138] sm:$0xff]  ;;  %v427_v56 = vld [vmem:[#allocation7 + $0x28] sm:$0xff] }
  0x40   :  { %835 = vmatprep.subr.mxu1 %v204_v40  ;;  %709 = vmatprep.subr.mxu0 %v187_v43  ;;  %v446_v43 = vld [vmem:[#allocation7 + $0xc0] sm:$0xff]  ;;  %v441_v60 = vld [vmem:[#allocation7 + $0x98] sm:$0xff]  ;;  %v455_v61 = vld [vmem:[#allocation7 + $0x108] sm:$0xff] }
  0x41   :  { %836 = vmatpush3.msra.mxu1 %v204_v40  ;;  %710 = vmatpush3.msra.mxu0 %v171_v44  ;;  %v431_v40 = vld [vmem:[#allocation7 + $0x48] sm:$0xff]  ;;  %v460_v44 = vld [vmem:[#allocation7 + $0x130] sm:$0xff]  ;;  %v426_v59 = vld [vmem:[#allocation7 + $0x20] sm:$0xff] }
  0x42   :  { %837 = vmatprep.subr.mxu1 %v203_v45  ;;  %711 = vmatprep.subr.mxu0 %v186_v48  ;;  %v459_v48 = vld [vmem:[#allocation7 + $0x128] sm:$0xff]  ;;  %v425_v62 = vld [vmem:[#allocation7 + $0x18] sm:$0xff]  ;;  %v424_v2 = vld [vmem:[#allocation7 + $0x10] sm:$0xff] }
  0x43   :  { %288 = vmatprep.mubr.f32.mxu0 %v1035_v41  ;;  %712 = vmatpush3.msra.mxu0 %v170_v53  ;;  %v428_v53 = vld [vmem:[#allocation7 + $0x30] sm:$0xff]  ;;  %v439_v3 = vld [vmem:[#allocation7 + $0x88] sm:$0xff] }
  0x44   :  { %838 = vmatpush3.msra.mxu1 %v203_v45  ;;  %713 = vmatprep.subr.mxu0 %v185_v54  ;;  %v430_v45 = vld [vmem:[#allocation7 + $0x40] sm:$0xff]  ;;  %v443_v54 = vld [vmem:[#allocation7 + $0xa8] sm:$0xff] }
  0x45   :  { %839 = vmatprep.subr.mxu1 %v202_v55  ;;  %714 = vmatpush3.msra.mxu0 %v169_v58  ;;  %v456_v58 = vld [vmem:[#allocation7 + $0x110] sm:$0xff] }
  0x46   :  { %840 = vmatpush3.msra.mxu1 %v202_v55  ;;  %674 = vmatmul.mubr.msk.f32.vlgmr.msra.gmra.mxu0 %vm1055_vm2, %v135_v0  ;;  %v457_v55 = vld [vmem:[#allocation7 + $0x118] sm:$0xff]  ;;  %v440_v0 = vld [vmem:[#allocation7 + $0x90] sm:$0xff] }
  0x47   :  { %841 = vmatprep.subr.mxu1 %v201_v1  ;;  %293 = vmatprep.mubr.f32.mxu0 %v1039_v46 }
  0x48   :  { %842 = vmatpush3.msra.mxu1 %v201_v1  ;;  %843 = vmatprep.mubr.f32.mxu1 %v155_v4  ;;  %v454_v1 = vld [vmem:[#allocation7 + $0x100] sm:$0xff]  ;;  %v423_v4 = vld [vmem:[#allocation7 + $0x8] sm:$0xff] }
  0x49   :  { %849 = vmatprep.subr.mxu1 %v469_v5  ;;  %844 = vmatmul.mubr.msk.f32.vlgmr.msra.gmra.mxu1 %vm1069_vm3, %v154_v7  ;;  %v422_v7 = vld [vmem:[#allocation7] sm:$0xff] }
  0x4a   :  { %747 = vmatprep.subr.mxu0 %v453_v9  ;;  %294 = vmatmul.mubr.f32.gmra.mxu0 %v134_v10  ;;  %v673_v10 = vld [vmem:[%s1147_s2] ss:$0 sm:$0xff] }
  0x4b   :  { %846 = vmatprep.mubr.f32.mxu1 %v153_v13  ;;  %298 = vmatprep.mubr.f32.mxu0 %v1045_v52 }
  0x4c   :  { %850 = vmatpush3.msra.mxu1 %v469_v5  ;;  %748 = vmatpush3.msra.mxu0 %v437_v15  ;;  %v438_v5 = vld [vmem:[#allocation7 + $0x80] sm:$0xff] }
  0x4d   :  { %851 = vmatprep.subr.mxu1 %v468_v14  ;;  %847 = vmatmul.mubr.msk.f32.gmra.mxu1 %vm1083_vm4, %v156_v17 }
  0x4e   :  { %749 = vmatprep.subr.mxu0 %v452_v18  ;;  %675 = vmatmul.mubr.msk.f32.gmra.mxu0 %vm1090_vm5, %v133_v20 }
  0x4f   :  { %852 = vmatpush3.msra.mxu1 %v468_v14  ;;  %303 = vmatprep.mubr.f32.mxu0 %v1037_v42 }
  0x50   :  { %853 = vmatprep.subr.mxu1 %v467_v21  ;;  %750 = vmatpush3.msra.mxu0 %v436_v22 }
  0x51   :  { %854 = vmatpush3.msra.mxu1 %v467_v21  ;;  %751 = vmatprep.subr.mxu0 %v451_v24 }
  0x52   :  { %855 = vmatprep.subr.mxu1 %v466_v23  ;;  %304 = vmatmul.mubr.f32.gmra.mxu0 %v132_v25 }
  0x53   :  { %856 = vmatpush3.msra.mxu1 %v466_v23  ;;  %752 = vmatpush3.msra.mxu0 %v435_v27 }
  0x54   :  { %857 = vmatprep.subr.mxu1 %v465_v26  ;;  %753 = vmatprep.subr.mxu0 %v450_v28 }
  0x55   :  { %858 = vmatpush3.msra.mxu1 %v465_v26  ;;  %754 = vmatpush3.msra.mxu0 %v434_v30 }
  0x56   :  { %859 = vmatprep.subr.mxu1 %v464_v29  ;;  %755 = vmatprep.subr.mxu0 %v449_v31 }
  0x57   :  { %860 = vmatpush3.msra.mxu1 %v464_v29  ;;  %756 = vmatpush3.msra.mxu0 %v433_v33 }
  0x58   :  { %861 = vmatprep.subr.mxu1 %v463_v32  ;;  %757 = vmatprep.subr.mxu0 %v448_v34 }
  0x59   :  { %862 = vmatpush3.msra.mxu1 %v463_v32  ;;  %758 = vmatpush3.msra.mxu0 %v432_v36 }
  0x5a   :  { %863 = vmatprep.subr.mxu1 %v462_v35  ;;  %759 = vmatprep.subr.mxu0 %v447_v37 }
  0x5b   :  { %864 = vmatpush3.msra.mxu1 %v462_v35  ;;  %760 = vmatpush3.msra.mxu0 %v431_v40 }
  0x5c   :  { %865 = vmatprep.subr.mxu1 %v461_v38  ;;  %761 = vmatprep.subr.mxu0 %v446_v43 }
  0x5d   :  { %866 = vmatpush3.msra.mxu1 %v461_v38  ;;  %762 = vmatpush3.msra.mxu0 %v430_v45 }
  0x5e   :  { %867 = vmatprep.subr.mxu1 %v460_v44  ;;  %763 = vmatprep.subr.mxu0 %v445_v47 }
  0x5f   :  { %868 = vmatpush3.msra.mxu1 %v460_v44  ;;  %764 = vmatpush3.msra.mxu0 %v429_v49 }
  0x60   :  { %869 = vmatprep.subr.mxu1 %v459_v48  ;;  %765 = vmatprep.subr.mxu0 %v444_v50 }
  0x61   :  { %870 = vmatpush3.msra.mxu1 %v459_v48  ;;  %766 = vmatpush3.msra.mxu0 %v428_v53 }
  0x62   :  { %871 = vmatprep.subr.mxu1 %v458_v51  ;;  %767 = vmatprep.subr.mxu0 %v443_v54 }
  0x63   :  { %872 = vmatpush3.msra.mxu1 %v458_v51  ;;  %768 = vmatpush3.msra.mxu0 %v427_v56 }
  0x64   :  { %873 = vmatprep.subr.mxu1 %v457_v55  ;;  %769 = vmatprep.subr.mxu0 %v442_v57 }
  0x65   :  { %874 = vmatpush3.msra.mxu1 %v457_v55  ;;  %770 = vmatpush3.msra.mxu0 %v426_v59  ;;  %v678_v59 = vld [vmem:[%s1149_s4] ss:$0 sm:$0xff]  ;;  %s984_s4 = smov [#allocation8]  }
  0x66   :  { %875 = vmatprep.subr.mxu1 %v456_v58  ;;  %771 = vmatprep.subr.mxu0 %v441_v60  ;;  %s660_s10 = sshll.u32 %s984_s4, 4  ;;  %s661_s10 = int_to_ptr.vmem [resolvable:$true] %s660_s10 }
  0x67   :  { %876 = vmatpush3.msra.mxu1 %v456_v58  ;;  %772 = vmatpush3.msra.mxu0 %v425_v62  ;;  %s953_s11 = scalar_lea.vmem %s661_s10, 512  ;;  %p958_p2 = scmp.lt.s32.totalorder %s661_s10, %s661_s10 }
  0x68   :  { %877 = vmatprep.subr.mxu1 %v455_v61  ;;  %773 = vmatprep.subr.mxu0 %v440_v0  ;;  %p954_p1 = scmp.ne.s32.totalorder %s661_s10, %s953_s11  ;;  %p959_p3 = scmp.lt.s32.totalorder %s953_s11, %s953_s11 }
  0x69   :  { %878 = vmatpush3.msra.mxu1 %v455_v61  ;;  %774 = vmatpush3.msra.mxu0 %v424_v2 }
  0x6a   :  { %879 = vmatprep.subr.mxu1 %v454_v1  ;;  %775 = vmatprep.subr.mxu0 %v439_v3  ;;  %p960_p4 = por %p959_p3, %p958_p2 }
  0x6b   :  { %880 = vmatpush3.msra.mxu1 %v454_v1  ;;  %776 = vmatpush3.msra.mxu0 %v423_v4 }
  0x6c   :  { %777 = vmatprep.subr.mxu0 %v438_v5  ;;  %p961_p5 = pnand %p960_p4, %p954_p1 }
  0x6d   :  { %778 = vmatpush3.msra.mxu0 %v422_v7 }
 0x106   :  { %v715_v8 = vpop.f32.mrf.mxu0 }
 0x108   :  { %v716_v9 = vpop.f32.mrf.mxu0 }
 0x109   :  { %v717_v11 = vadd.f32 %v716_v9, %v715_v8  ;;  %v845_v12 = vpop.f32.mrf.mxu1 }
 0x10a   :  { %v718_v13 = vpop.f32.mrf.mxu0 }
 0x10b   :  { %v291_v14 = vadd.f32 %v717_v11, %v673_v10  ;;  %v375_v15 = vpop.f32.mrf.mxu1 }
 0x10c   :  { %v719_v17 = vpop.f32.mrf.mxu0 }
 0x10d   :  { %v720_v18 = vadd.f32 %v719_v17, %v718_v13  ;;  %v376_v20 = vadd.f32 %v375_v15, %v291_v14  ;;  %v848_v22 = vpop.f32.mrf.mxu1 }
 0x10e   :  { %v721_v21 = vpop.f32.mrf.mxu0 }
 0x10f   :  { %v296_v23 = vadd.f32 %v720_v18, %v673_v10  ;;  %v394_v24 = vmax.f32 %v376_v20, 0.0  ;;  %v385_v29 = vpop.f32.mrf.mxu1 }
 0x110   :  { %v722_v25 = vpop.f32.mrf.mxu0 }
 0x111   :  { %v381_v26 = vadd.f32 %v845_v12, %v296_v23  ;;  %v723_v27 = vadd.f32 %v722_v25, %v721_v21  ;;  %541 = vmatprep.mubr.f32.mxu0 %v394_v24  ;;  %v410_v33 = vrot.slane %v394_v24, 1  ;;  %v398_v48 = vrot.slane %v394_v24, 7 }
 0x112   :  { %v724_v28 = vpop.f32.mrf.mxu0 }
 0x113   :  { %v395_v30 = vmax.f32 %v381_v26, 0.0  ;;  %v301_v31 = vadd.f32 %v723_v27, %v673_v10 }
 0x114   :  { %v725_v32 = vpop.f32.mrf.mxu0 }
 0x115   :  { %v726_v34 = vadd.f32 %v725_v32, %v724_v28  ;;  %v386_v35 = vadd.f32 %v385_v29, %v301_v31  ;;  %v411_v36 = vrot.slane %v395_v30, 1  ;;  %v399_v55 = vrot.slane %v395_v30, 7 }
 0x117   :  { %v306_v37 = vadd.f32 %v726_v34, %v673_v10  ;;  %v396_v38 = vmax.f32 %v386_v35, 0.0  ;;  %v416_v40 = vsel %vm152_vm1, %v410_v33, %v411_v36  ;;  %v404_v56 = vsel %vm131_vm0, %v398_v48, %v399_v55 }
 0x118   :  { %881 = vmatprep.mubr.f32.mxu1 %v416_v40 }
 0x119   :  { %v391_v43 = vadd.f32 %v848_v22, %v306_v37  ;;  %v412_v44 = vrot.slane %v396_v38, 1  ;;  %v400_v6 = vrot.slane %v396_v38, 7 }
 0x11b   :  { %v397_v45 = vmax.f32 %v391_v43, 0.0  ;;  %v415_v47 = vsel %vm152_vm1, %v411_v36, %v412_v44  ;;  %v403_v57 = vsel %vm131_vm0, %v399_v55, %v400_v6 }
 0x11c   :  { %882 = vmatmul.mubr.msk.f32.vlgmr.msra.gmra.mxu1 %vm1069_vm3, %v415_v47 }
 0x11d   :  { %v401_v49 = vrot.slane %v397_v45, 7  ;;  %v413_v50 = vrot.slane %v397_v45, 1 }
 0x11f   :  { %v405_v51 = vsel %vm131_vm0, %v401_v49, %v398_v48  ;;  %v414_v53 = vsel %vm152_vm1, %v412_v44, %v413_v50  ;;  %v417_v54 = vsel %vm152_vm1, %v413_v50, %v410_v33  ;;  %v402_v63 = vsel %vm131_vm0, %v400_v6, %v401_v49 }
 0x120   :  { %679 = vmatmul.mubr.msk.f32.vlgmr.msra.gmra.mxu0 %vm1055_vm2, %v405_v51  ;;  %884 = vmatprep.mubr.f32.mxu1 %v414_v53 }
 0x121   :  { %546 = vmatprep.mubr.f32.mxu0 %v395_v30  ;;  %885 = vmatmul.mubr.msk.f32.gmra.mxu1 %vm1083_vm4, %v417_v54 }
 0x124   :  { %547 = vmatmul.mubr.f32.gmra.mxu0 %v404_v56 }
 0x125   :  { %551 = vmatprep.mubr.f32.mxu0 %v396_v38 }
 0x128   :  { %680 = vmatmul.mubr.msk.f32.gmra.mxu0 %vm1090_vm5, %v403_v57 }
 0x129   :  { %556 = vmatprep.mubr.f32.mxu0 %v397_v45 }
 0x12c   :  { %557 = vmatmul.mubr.f32.gmra.mxu0 %v402_v63 }
 0x1dc   :  { %v883_v16 = vpop.f32.mrf.mxu1 }
 0x1de   :  { %v628_v1 = vpop.f32.mrf.mxu1 }
 0x1e0   :  { %v779_v58 = vpop.f32.mrf.mxu0 }
 0x1e1   :  { %v886_v7 = vpop.f32.mrf.mxu1 }
 0x1e2   :  { %v780_v60 = vpop.f32.mrf.mxu0 }
 0x1e3   :  { %v781_v61 = vadd.f32 %v780_v60, %v779_v58  ;;  %v638_v14 = vpop.f32.mrf.mxu1 }
 0x1e4   :  { %v782_v62 = vpop.f32.mrf.mxu0 }
 0x1e5   :  { %v544_v0 = vadd.f32 %v781_v61, %v678_v59 }
 0x1e6   :  { %v783_v2 = vpop.f32.mrf.mxu0 }
 0x1e7   :  { %v629_v3 = vadd.f32 %v628_v1, %v544_v0  ;;  %v784_v19 = vadd.f32 %v783_v2, %v782_v62 }
 0x1e8   :  { %v785_v4 = vpop.f32.mrf.mxu0 }
 0x1e9   :  { %v647_v5 = vadd.f32 %v629_v3, %v1035_v41  ;;  %v549_v39 = vadd.f32 %v784_v19, %v678_v59 }
 0x1ea   :  { %v786_v8 = vpop.f32.mrf.mxu0 }
 0x1eb   :  { %651 = vst [vmem:[#allocation8] sm:$0xff] %v647_v5  ;;  %v634_v9 = vadd.f32 %v883_v16, %v549_v39  ;;  %v787_v10 = vadd.f32 %v786_v8, %v785_v4 }
 0x1ec   :  { %v788_v11 = vpop.f32.mrf.mxu0 }
 0x1ed   :  { %v648_v12 = vadd.f32 %v634_v9, %v1039_v46  ;;  %v554_v13 = vadd.f32 %v787_v10, %v678_v59 }
 0x1ee   :  { %v789_v15 = vpop.f32.mrf.mxu0 }
 0x1ef   :  { %652 = vst [vmem:[#allocation8 + $0x8] sm:$0xff] %v648_v12  ;;  %v639_v17 = vadd.f32 %v638_v14, %v554_v13  ;;  %v790_v18 = vadd.f32 %v789_v15, %v788_v11 }
 0x1f1   :  { %v649_v20 = vadd.f32 %v639_v17, %v1045_v52  ;;  %v559_v21 = vadd.f32 %v790_v18, %v678_v59 }
 0x1f3   :  { %653 = vst [vmem:[#allocation8 + $0x10] sm:$0xff] %v649_v20  ;;  %v644_v41 = vadd.f32 %v886_v7, %v559_v21 }
 0x1f5   :  { %v650_v22 = vadd.f32 %v644_v41, %v1037_v42 }
 0x1f7   :  { %654 = vst [vmem:[#allocation8 + $0x18] sm:$0xff] %v650_v22 }
 0x1f8   :  { %964 = shalt.err (!%p961_p5)
}
 0x1f9   :  { %666 = dma.vmem_to_hbm [thread:$0]  %s661_s10, 512, %s1150_s5, [#allocation4], %s981_s23, %s981_s23, %s982_s24  }
 0x1fa   :  { %977 = dma.done.wait [#allocation4], 512  }
 0x1fb   :  { %978 = vsyncadd [#allocation4], 4294966784 }
 0x1fc   :  { %670 = vsyncpa [#allocation3], 1 }
 0x1fd   :  { %671 = vsyncpa [#allocation6], 1 }
 0x1fe   :  { %672 = vsyncpa [#allocation4], 1 }

</bundles_post_ra>
